<compile_context>
chip_gen: v7x
topology: tpu7x:2x2x1
jax: 0.10.0
libtpu: 0.0.40
codegen_flags: <defaults>
</compile_context>

<pallas_src>
import functools

import numpy as np
import jax
import jax.numpy as jnp
from jax import lax
from jax.experimental import pallas as pl
from jax.experimental.pallas import tpu as pltpu

EPS = 1e-5

# bf16 on the MXU / HBM-transit path (all generations are bf16-native on the
# MXU).  Set both to jnp.float32 to recover ~1e-5 agreement with the f32
# reference (at reduced MXU rate and 2x the activation HBM bytes).
MXU_DTYPE = jnp.bfloat16
ACT_DTYPE = jnp.bfloat16


# ---------------------------------------------------------------------------
# Init-time weight preparation: 3x3 "SAME" conv as ONE matmul on lane-fused
# rows.  band[(dy*W + wi)*Cin + ci, wo*Cout + co] = w[co, ci, dy, wi - wo + 1]
# (zero outside the +-1 band), so that
#   y_fused[h] = concat(x_fused[h-1], x_fused[h], x_fused[h+1]) @ band
# with zero rows at the top/bottom image border.
# ---------------------------------------------------------------------------
def make_band_weights(w_oihw, width):
    w = np.asarray(w_oihw, np.float32)
    cout, cin, kh, kw = w.shape
    band = np.zeros((kh, width * cin, width * cout), np.float32)
    for dy in range(kh):
        for dx in range(kw):
            blk = w[:, :, dy, dx].T                      # (Cin, Cout)
            for wo in range(width):
                wi = wo + dx - 1                          # padding = 1
                if 0 <= wi < width:
                    band[dy, wi * cin:(wi + 1) * cin,
                         wo * cout:(wo + 1) * cout] = blk
    return jnp.asarray(band.reshape(kh * width * cin, width * cout),
                       dtype=MXU_DTYPE)


def _pick_batch_block(n, h, w, c):
    """Images per grid step: keep grid length >= 2 (both v7x TCs busy) and the
    per-step f32 working set well under the 32 MiB scoped-VMEM default."""
    cap = max(1, (4 << 20) // max(1, h * w * c * 4))
    if n < 2:
        return 1
    best = 1
    for bb in range(1, min(n // 2, cap) + 1):
        if n % bb == 0:
            best = bb
    return best


def _shifted_rows(x3, h):
    """x3: (B_blk, H, W*C).  Returns (B_blk*H, 3*W*C) rows holding
    [row h-1 | row h | row h+1] with zero rows at the image borders."""
    bb, _, wc = x3.shape
    z = jnp.zeros((bb, 1, wc), x3.dtype)
    up = jnp.concatenate([z, x3[:, :h - 1]], axis=1)      # holds row h-1
    down = jnp.concatenate([x3[:, 1:], z], axis=1)        # holds row h+1
    return jnp.concatenate([up, x3, down], axis=-1).reshape(bb * h, 3 * wc)


# ---------------------------------------------------------------------------
# Kernel A: conv1 (one banded MXU matmul) + BN1 partial stats, lane-dense.
#   x_ref  : (B_blk*H, W*Cin)   lane-fused input (MXU dtype)
#   wb_ref : (3*W*Cin, W*Cmid)  banded conv1 weight
#   y_ref  : (B_blk*H, W*Cmid)  conv1 output (ACT dtype, 128-lane dense store)
#   st_ref : (1, 2, W*Cmid)     packed [sum ; sum-of-squares] over block rows
# ---------------------------------------------------------------------------
def conv1_stats_kernel(x_ref, wb_ref, y_ref, st_ref, *, H):
    BH, WCin = x_ref.shape
    Bb = BH // H
    xs = _shifted_rows(x_ref[...].reshape(Bb, H, WCin), H)
    y = jnp.dot(xs, wb_ref[...], preferred_element_type=jnp.float32)
    st_ref[0] = jnp.concatenate(
        [jnp.sum(y, axis=0, keepdims=True),
         jnp.sum(y * y, axis=0, keepdims=True)], axis=0)
    y_ref[...] = y.astype(y_ref.dtype)


# ---------------------------------------------------------------------------
# Kernel B: BN1 (folded scale/shift, f32) + PReLU, then conv2 as one banded
# MXU matmul + BN2 partial stats.  Everything lane-dense.
# ---------------------------------------------------------------------------
def bn1_conv2_stats_kernel(y1_ref, scsh_ref, wb_ref, a_ref, y2_ref, st_ref, *, H):
    BH, WCm = y1_ref.shape
    Bb = BH // H
    a = a_ref[0, 0]
    n = y1_ref[...].astype(jnp.float32) * scsh_ref[0:1, :] + scsh_ref[1:2, :]
    hmid = jnp.where(n > 0, n, a * n).astype(wb_ref.dtype)   # MXU operand dtype
    hs = _shifted_rows(hmid.reshape(Bb, H, WCm), H)
    y2 = jnp.dot(hs, wb_ref[...], preferred_element_type=jnp.float32)
    st_ref[0] = jnp.concatenate(
        [jnp.sum(y2, axis=0, keepdims=True),
         jnp.sum(y2 * y2, axis=0, keepdims=True)], axis=0)
    y2_ref[...] = y2.astype(y2_ref.dtype)


# ---------------------------------------------------------------------------
# BN glue: fold per-block lane-fused partial sums into per-channel scale/shift
# (training-mode batch stats).
# ---------------------------------------------------------------------------
def _fold_bn(stats, gamma, beta, count):
    C = gamma.size
    s = stats[:, 0, :].reshape(stats.shape[0], -1, C).sum(axis=(0, 1))
    ss = stats[:, 1, :].reshape(stats.shape[0], -1, C).sum(axis=(0, 1))
    mean = s / count
    var = jnp.maximum(ss / count - mean * mean, 0.0)   # guard cancellation
    scale = gamma.reshape(-1) * lax.rsqrt(var + EPS)
    shift = beta.reshape(-1) - mean * scale
    return scale, shift


# ---------------------------------------------------------------------------
# Forward wrapper.  x is NCHW (PyTorch layout); wb1/wb2 are the pre-built
# banded weights from make_band_weights.  Returns NCHW.
# ---------------------------------------------------------------------------
def encoder_block(x_nchw, wb1, g1, b1, wb2, g2, b2, a):
    N, Cin, H, W = x_nchw.shape
    Cmid = wb1.shape[1] // W
    Cout = wb2.shape[1] // W
    cnt = float(N * H * W)

    B_blk = _pick_batch_block(N, H, W, max(Cmid, Cout))
    G = N // B_blk
    cparams = pltpu.CompilerParams(dimension_semantics=("parallel",))
    smem_spec = pl.BlockSpec((1, 1), lambda b: (0, 0),
                             memory_space=pltpu.MemorySpace.SMEM)

    # lane-fused (N*H, W*Cin) input, cast once for the MXU path
    x_fused = jnp.transpose(x_nchw, (0, 2, 3, 1)).reshape(N * H, W * Cin)
    x_fused = x_fused.astype(MXU_DTYPE)

    # ---- pass 1: conv1 + BN1 partial stats ---------------------------------
    y1, st1 = pl.pallas_call(
        functools.partial(conv1_stats_kernel, H=H),
        grid=(G,),
        in_specs=[
            pl.BlockSpec((B_blk * H, W * Cin), lambda b: (b, 0)),
            pl.BlockSpec((3 * W * Cin, W * Cmid), lambda b: (0, 0)),
        ],
        out_specs=(
            pl.BlockSpec((B_blk * H, W * Cmid), lambda b: (b, 0)),
            pl.BlockSpec((1, 2, W * Cmid), lambda b: (b, 0, 0)),
        ),
        out_shape=(
            jax.ShapeDtypeStruct((N * H, W * Cmid), ACT_DTYPE),
            jax.ShapeDtypeStruct((G, 2, W * Cmid), jnp.float32),
        ),
        compiler_params=cparams,
    )(x_fused, wb1)

    scale1, shift1 = _fold_bn(st1, g1, b1, cnt)
    scsh1 = jnp.stack([jnp.tile(scale1, W), jnp.tile(shift1, W)])   # (2, W*Cmid)

    # ---- pass 2: BN1 + PReLU + conv2 + BN2 partial stats --------------------
    y2, st2 = pl.pallas_call(
        functools.partial(bn1_conv2_stats_kernel, H=H),
        grid=(G,),
        in_specs=[
            pl.BlockSpec((B_blk * H, W * Cmid), lambda b: (b, 0)),
            pl.BlockSpec((2, W * Cmid), lambda b: (0, 0)),
            pl.BlockSpec((3 * W * Cmid, W * Cout), lambda b: (0, 0)),
            smem_spec,
        ],
        out_specs=(
            pl.BlockSpec((B_blk * H, W * Cout), lambda b: (b, 0)),
            pl.BlockSpec((1, 2, W * Cout), lambda b: (b, 0, 0)),
        ),
        out_shape=(
            jax.ShapeDtypeStruct((N * H, W * Cout), ACT_DTYPE),
            jax.ShapeDtypeStruct((G, 2, W * Cout), jnp.float32),
        ),
        compiler_params=cparams,
    )(y1, scsh1, wb2, a)

    # ---- pass 3: BN2 + PReLU as plain XLA (fuses with reshape/transpose) ----
    scale2, shift2 = _fold_bn(st2, g2, b2, cnt)
    o = y2.astype(jnp.float32).reshape(N, H, W, Cout) * scale2 + shift2
    o = jnp.where(o > 0, o, a[0, 0] * o)
    return jnp.transpose(o, (0, 3, 1, 2))                 # -> NCHW


# ---------------------------------------------------------------------------
# Plain-JAX f32 reference mirroring the PyTorch forward (training-mode BN).
# ---------------------------------------------------------------------------
def reference_forward(x_nchw, w1, g1, b1, w2, g2, b2, a):
    def conv(x, w):
        return lax.conv_general_dilated(
            x, w, window_strides=(1, 1), padding="SAME",
            dimension_numbers=("NCHW", "OIHW", "NCHW"))

    def bn_prelu(y, g, b):
        mean = jnp.mean(y, axis=(0, 2, 3), keepdims=True)
        var = jnp.mean((y - mean) ** 2, axis=(0, 2, 3), keepdims=True)
        n = (y - mean) / jnp.sqrt(var + EPS) * g.reshape(1, -1, 1, 1) \
            + b.reshape(1, -1, 1, 1)
        return jnp.where(n > 0, n, a[0, 0] * n)

    y = bn_prelu(conv(x_nchw, w1), g1, b1)
    return bn_prelu(conv(y, w2), g2, b2)


if __name__ == "__main__":
    # Small shapes consistent with the module: input_nc=4, middle_nc=8, output_nc=8.
    N, Cin, Cmid, Cout, H, W = 2, 4, 8, 8, 16, 16

    key = jax.random.PRNGKey(0)
    ks = jax.random.split(key, 8)
    x = jax.random.normal(ks[0], (N, Cin, H, W), jnp.float32)
    w1 = 0.2 * jax.random.normal(ks[1], (Cmid, Cin, 3, 3), jnp.float32)
    w2 = 0.2 * jax.random.normal(ks[2], (Cout, Cmid, 3, 3), jnp.float32)
    g1 = 1.0 + 0.1 * jax.random.normal(ks[3], (1, Cmid), jnp.float32)
    b1 = 0.1 * jax.random.normal(ks[4], (1, Cmid), jnp.float32)
    g2 = 1.0 + 0.1 * jax.random.normal(ks[5], (1, Cout), jnp.float32)
    b2 = 0.1 * jax.random.normal(ks[6], (1, Cout), jnp.float32)
    a = jnp.full((1, 1), 0.25, jnp.float32)        # nn.PReLU() default init

    # banded (im2col-free) conv weights built ONCE at init, cast to MXU dtype
    wb1 = make_band_weights(w1, W)                 # (3*W*Cin,  W*Cmid)
    wb2 = make_band_weights(w2, W)                 # (3*W*Cmid, W*Cout)

    fwd = jax.jit(encoder_block)
    out = jax.block_until_ready(fwd(x, wb1, g1, b1, wb2, g2, b2, a))

    ref = jax.block_until_ready(reference_forward(x, w1, g1, b1, w2, g2, b2, a))
    assert out.shape == (N, Cout, H, W), out.shape
    # tolerance loosened vs. the f32 reference because MXU operands and the
    # inter-pass activations travel in bfloat16 (expected per the perf review)
    err = float(jnp.max(jnp.abs(out - ref)))
    assert jnp.allclose(out, ref, atol=7e-2, rtol=7e-2), err

    print("KERNEL_OK")
</pallas_src>

<mosaic_0001>
module attributes {stable_mosaic.version = 11 : i64} {
  func.func @conv1_stats_kernel(%arg0: i32, %arg1: memref<16x64xbf16, #tpu.memory_space<vmem>>, %arg2: memref<192x128xbf16, #tpu.memory_space<vmem>>, %arg3: memref<16x128xbf16, #tpu.memory_space<vmem>>, %arg4: memref<1x2x128xf32, #tpu.memory_space<vmem>>) attributes {dimension_semantics = [#tpu.dimension_semantics<parallel>], iteration_bounds = array<i64: 2>, scalar_prefetch = 0 : i64, scratch_operands = 0 : i64, tpu.core_type = #tpu.core_type<tc>, window_params = [{transform_indices = @transform_0, window_bounds = array<i64: 16, 64>}, {pipeline_mode = #tpu.pipeline_mode<synchronous>, transform_indices = @transform_1, window_bounds = array<i64: 192, 128>}, {transform_indices = @transform_2, window_bounds = array<i64: 16, 128>}, {transform_indices = @transform_3, window_bounds = array<i64: 1, 2, 128>}]} {
    %c0 = arith.constant 0 : index
    %c0_0 = arith.constant 0 : index
    %0 = vector.load %arg1[%c0, %c0_0] : memref<16x64xbf16, #tpu.memory_space<vmem>>, vector<16x64xbf16>
    %1 = vector.shape_cast %0 : vector<16x64xbf16> to vector<1x16x64xbf16>
    %cst = arith.constant 0.000000e+00 : bf16
    %2 = vector.broadcast %cst : bf16 to vector<1x1x64xbf16>
    %3 = vector.extract_strided_slice %1 {offsets = [0, 0, 0], sizes = [1, 15, 64], strides = [1, 1, 1]} : vector<1x16x64xbf16> to vector<1x15x64xbf16>
    %4 = tpu.concatenate %2, %3 in 1 : vector<1x1x64xbf16>, vector<1x15x64xbf16> -> vector<1x16x64xbf16>
    %5 = vector.extract_strided_slice %1 {offsets = [0, 1, 0], sizes = [1, 15, 64], strides = [1, 1, 1]} : vector<1x16x64xbf16> to vector<1x15x64xbf16>
    %6 = tpu.concatenate %5, %2 in 1 : vector<1x15x64xbf16>, vector<1x1x64xbf16> -> vector<1x16x64xbf16>
    %7 = tpu.concatenate %4, %1, %6 in 2 : vector<1x16x64xbf16>, vector<1x16x64xbf16>, vector<1x16x64xbf16> -> vector<1x16x192xbf16>
    %8 = vector.shape_cast %7 : vector<1x16x192xbf16> to vector<16x192xbf16>
    %c0_1 = arith.constant 0 : index
    %c0_2 = arith.constant 0 : index
    %9 = vector.load %arg2[%c0_1, %c0_2] : memref<192x128xbf16, #tpu.memory_space<vmem>>, vector<192x128xbf16>
    %cst_3 = arith.constant dense<0.000000e+00> : vector<16x128xf32>
    %10 = tpu.matmul %8, %9, %cst_3 {dimension_numbers = #tpu.dot_dimension_numbers<[1], [0], [0], [1], [0, 0, 1, 1], [], []>} : vector<16x192xbf16>, vector<192x128xbf16>, vector<16x128xf32> -> vector<16x128xf32>
    %cst_4 = arith.constant dense<0.000000e+00> : vector<128xf32>
    %11 = vector.multi_reduction <add>, %10, %cst_4 [0] : vector<16x128xf32> to vector<128xf32>
    %12 = vector.shape_cast %11 : vector<128xf32> to vector<1x128xf32>
    %13 = arith.mulf %10, %10 : vector<16x128xf32>
    %cst_5 = arith.constant dense<0.000000e+00> : vector<128xf32>
    %14 = vector.multi_reduction <add>, %13, %cst_5 [0] : vector<16x128xf32> to vector<128xf32>
    %15 = vector.shape_cast %14 : vector<128xf32> to vector<1x128xf32>
    %16 = tpu.concatenate %12, %15 in 0 : vector<1x128xf32>, vector<1x128xf32> -> vector<2x128xf32>
    %c0_6 = arith.constant 0 : index
    %c0_7 = arith.constant 0 : index
    %c0_8 = arith.constant 0 : index
    %17 = vector.load %arg4[%c0_6, %c0_7, %c0_8] : memref<1x2x128xf32, #tpu.memory_space<vmem>>, vector<1x2x128xf32>
    %18 = vector.shape_cast %17 : vector<1x2x128xf32> to vector<2x128xf32>
    %19 = vector.shape_cast %16 : vector<2x128xf32> to vector<1x2x128xf32>
    tpu.vector_store %arg4[%c0_6, %c0_7, %c0_8], %19 {strides = array<i32>} : memref<1x2x128xf32, #tpu.memory_space<vmem>>, vector<1x2x128xf32>,
    %20 = arith.truncf %10 : vector<16x128xf32> to vector<16x128xbf16>
    %c0_9 = arith.constant 0 : index
    %c0_10 = arith.constant 0 : index
    %21 = vector.load %arg3[%c0_9, %c0_10] : memref<16x128xbf16, #tpu.memory_space<vmem>>, vector<16x128xbf16>
    tpu.vector_store %arg3[%c0_9, %c0_10], %20 {strides = array<i32>} : memref<16x128xbf16, #tpu.memory_space<vmem>>, vector<16x128xbf16>,
    return
  }
  func.func @transform_0(%arg0: i32) -> (i32, i32) {
    %c0_i32 = arith.constant 0 : i32
    %c0_i32_0 = arith.constant 0 : i32
    return %arg0, %c0_i32 : i32, i32
  }
  func.func @transform_1(%arg0: i32) -> (i32, i32) {
    %c0_i32 = arith.constant 0 : i32
    %c0_i32_0 = arith.constant 0 : i32
    %c0_i32_1 = arith.constant 0 : i32
    return %c0_i32, %c0_i32_0 : i32, i32
  }
  func.func @transform_2(%arg0: i32) -> (i32, i32) {
    %c0_i32 = arith.constant 0 : i32
    %c0_i32_0 = arith.constant 0 : i32
    return %arg0, %c0_i32 : i32, i32
  }
  func.func @transform_3(%arg0: i32) -> (i32, i32, i32) {
    %c0_i32 = arith.constant 0 : i32
    %c0_i32_0 = arith.constant 0 : i32
    %c0_i32_1 = arith.constant 0 : i32
    return %arg0, %c0_i32, %c0_i32_0 : i32, i32, i32
  }
}

module attributes {stable_mosaic.version = 11 : i64} {
  func.func @bn1_conv2_stats_kernel(%arg0: i32, %arg1: memref<16x128xbf16, #tpu.memory_space<vmem>>, %arg2: memref<2x128xf32, #tpu.memory_space<vmem>>, %arg3: memref<384x128xbf16, #tpu.memory_space<vmem>>, %arg4: memref<1x1xf32, #tpu.memory_space<smem>>, %arg5: memref<16x128xbf16, #tpu.memory_space<vmem>>, %arg6: memref<1x2x128xf32, #tpu.memory_space<vmem>>) attributes {dimension_semantics = [#tpu.dimension_semantics<parallel>], iteration_bounds = array<i64: 2>, scalar_prefetch = 0 : i64, scratch_operands = 0 : i64, tpu.core_type = #tpu.core_type<tc>, window_params = [{transform_indices = @transform_0, window_bounds = array<i64: 16, 128>}, {pipeline_mode = #tpu.pipeline_mode<synchronous>, transform_indices = @transform_1, window_bounds = array<i64: 2, 128>}, {pipeline_mode = #tpu.pipeline_mode<synchronous>, transform_indices = @transform_2, window_bounds = array<i64: 384, 128>}, {transform_indices = @transform_3, window_bounds = array<i64: 1, 1>}, {transform_indices = @transform_4, window_bounds = array<i64: 16, 128>}, {transform_indices = @transform_5, window_bounds = array<i64: 1, 2, 128>}]} {
    %c0 = arith.constant 0 : index
    %c0_0 = arith.constant 0 : index
    %0 = memref.load %arg4[%c0, %c0_0] : memref<1x1xf32, #tpu.memory_space<smem>>
    %c0_1 = arith.constant 0 : index
    %c0_2 = arith.constant 0 : index
    %1 = vector.load %arg1[%c0_1, %c0_2] : memref<16x128xbf16, #tpu.memory_space<vmem>>, vector<16x128xbf16>
    %2 = arith.extf %1 : vector<16x128xbf16> to vector<16x128xf32>
    %c0_3 = arith.constant 0 : index
    %c0_4 = arith.constant 0 : index
    %3 = vector.load %arg2[%c0_3, %c0_4] : memref<2x128xf32, #tpu.memory_space<vmem>>, vector<1x128xf32>
    %4 = vector.broadcast %3 : vector<1x128xf32> to vector<16x128xf32>
    %5 = arith.mulf %2, %4 : vector<16x128xf32>
    %c1 = arith.constant 1 : index
    %c0_5 = arith.constant 0 : index
    %6 = vector.load %arg2[%c1, %c0_5] : memref<2x128xf32, #tpu.memory_space<vmem>>, vector<1x128xf32>
    %7 = vector.broadcast %6 : vector<1x128xf32> to vector<16x128xf32>
    %8 = arith.addf %5, %7 : vector<16x128xf32>
    %cst = arith.constant 0.000000e+00 : f32
    %9 = vector.broadcast %cst : f32 to vector<16x128xf32>
    %10 = arith.cmpf ogt, %8, %9 : vector<16x128xf32>
    %11 = vector.broadcast %0 : f32 to vector<16x128xf32>
    %12 = arith.mulf %11, %8 : vector<16x128xf32>
    %13 = arith.select %10, %8, %12 : vector<16x128xi1>, vector<16x128xf32>
    %14 = arith.truncf %13 : vector<16x128xf32> to vector<16x128xbf16>
    %15 = vector.shape_cast %14 : vector<16x128xbf16> to vector<1x16x128xbf16>
    %cst_6 = arith.constant 0.000000e+00 : bf16
    %16 = vector.broadcast %cst_6 : bf16 to vector<1x1x128xbf16>
    %17 = vector.extract_strided_slice %15 {offsets = [0, 0, 0], sizes = [1, 15, 128], strides = [1, 1, 1]} : vector<1x16x128xbf16> to vector<1x15x128xbf16>
    %18 = tpu.concatenate %16, %17 in 1 : vector<1x1x128xbf16>, vector<1x15x128xbf16> -> vector<1x16x128xbf16>
    %19 = vector.extract_strided_slice %15 {offsets = [0, 1, 0], sizes = [1, 15, 128], strides = [1, 1, 1]} : vector<1x16x128xbf16> to vector<1x15x128xbf16>
    %20 = tpu.concatenate %19, %16 in 1 : vector<1x15x128xbf16>, vector<1x1x128xbf16> -> vector<1x16x128xbf16>
    %21 = tpu.concatenate %18, %15, %20 in 2 : vector<1x16x128xbf16>, vector<1x16x128xbf16>, vector<1x16x128xbf16> -> vector<1x16x384xbf16>
    %22 = vector.shape_cast %21 : vector<1x16x384xbf16> to vector<16x384xbf16>
    %c0_7 = arith.constant 0 : index
    %c0_8 = arith.constant 0 : index
    %23 = vector.load %arg3[%c0_7, %c0_8] : memref<384x128xbf16, #tpu.memory_space<vmem>>, vector<384x128xbf16>
    %cst_9 = arith.constant dense<0.000000e+00> : vector<16x128xf32>
    %24 = tpu.matmul %22, %23, %cst_9 {dimension_numbers = #tpu.dot_dimension_numbers<[1], [0], [0], [1], [0, 0, 1, 1], [], []>} : vector<16x384xbf16>, vector<384x128xbf16>, vector<16x128xf32> -> vector<16x128xf32>
    %cst_10 = arith.constant dense<0.000000e+00> : vector<128xf32>
    %25 = vector.multi_reduction <add>, %24, %cst_10 [0] : vector<16x128xf32> to vector<128xf32>
    %26 = vector.shape_cast %25 : vector<128xf32> to vector<1x128xf32>
    %27 = arith.mulf %24, %24 : vector<16x128xf32>
    %cst_11 = arith.constant dense<0.000000e+00> : vector<128xf32>
    %28 = vector.multi_reduction <add>, %27, %cst_11 [0] : vector<16x128xf32> to vector<128xf32>
    %29 = vector.shape_cast %28 : vector<128xf32> to vector<1x128xf32>
    %30 = tpu.concatenate %26, %29 in 0 : vector<1x128xf32>, vector<1x128xf32> -> vector<2x128xf32>
    %c0_12 = arith.constant 0 : index
    %c0_13 = arith.constant 0 : index
    %c0_14 = arith.constant 0 : index
    %31 = vector.load %arg6[%c0_12, %c0_13, %c0_14] : memref<1x2x128xf32, #tpu.memory_space<vmem>>, vector<1x2x128xf32>
    %32 = vector.shape_cast %31 : vector<1x2x128xf32> to vector<2x128xf32>
    %33 = vector.shape_cast %30 : vector<2x128xf32> to vector<1x2x128xf32>
    tpu.vector_store %arg6[%c0_12, %c0_13, %c0_14], %33 {strides = array<i32>} : memref<1x2x128xf32, #tpu.memory_space<vmem>>, vector<1x2x128xf32>,
    %34 = arith.truncf %24 : vector<16x128xf32> to vector<16x128xbf16>
    %c0_15 = arith.constant 0 : index
    %c0_16 = arith.constant 0 : index
    %35 = vector.load %arg5[%c0_15, %c0_16] : memref<16x128xbf16, #tpu.memory_space<vmem>>, vector<16x128xbf16>
    tpu.vector_store %arg5[%c0_15, %c0_16], %34 {strides = array<i32>} : memref<16x128xbf16, #tpu.memory_space<vmem>>, vector<16x128xbf16>,
    return
  }
  func.func @transform_0(%arg0: i32) -> (i32, i32) {
    %c0_i32 = arith.constant 0 : i32
    %c0_i32_0 = arith.constant 0 : i32
    return %arg0, %c0_i32 : i32, i32
  }
  func.func @transform_1(%arg0: i32) -> (i32, i32) {
    %c0_i32 = arith.constant 0 : i32
    %c0_i32_0 = arith.constant 0 : i32
    %c0_i32_1 = arith.constant 0 : i32
    return %c0_i32, %c0_i32_0 : i32, i32
  }
  func.func @transform_2(%arg0: i32) -> (i32, i32) {
    %c0_i32 = arith.constant 0 : i32
    %c0_i32_0 = arith.constant 0 : i32
    %c0_i32_1 = arith.constant 0 : i32
    return %c0_i32, %c0_i32_0 : i32, i32
  }
  func.func @transform_3(%arg0: i32) -> (i32, i32) {
    %c0_i32 = arith.constant 0 : i32
    %c0_i32_0 = arith.constant 0 : i32
    %c0_i32_1 = arith.constant 0 : i32
    return %c0_i32, %c0_i32_0 : i32, i32
  }
  func.func @transform_4(%arg0: i32) -> (i32, i32) {
    %c0_i32 = arith.constant 0 : i32
    %c0_i32_0 = arith.constant 0 : i32
    return %arg0, %c0_i32 : i32, i32
  }
  func.func @transform_5(%arg0: i32) -> (i32, i32, i32) {
    %c0_i32 = arith.constant 0 : i32
    %c0_i32_0 = arith.constant 0 : i32
    %c0_i32_1 = arith.constant 0 : i32
    return %arg0, %c0_i32, %c0_i32_0 : i32, i32, i32
  }
}

</mosaic_0001>

<bundles_post_ra>
// kernel: tile.13
= control target key start
LH: loop header
LB: loop body
LE: loop exit
PB: predicated region body
PF: predicated region fallthrough
CT: control target
= control target key end

     0   :  { %s28_s0 = inlined_call_operand.vmem [shape: f32[8], index: 0, kind: input, shape index: {}]   ;;  %s29_s1 = inlined_call_operand.vmem [shape: f32[16,8], index: 1, kind: output, shape index: {}]  }
   0x1   :  { %v4_v0 = vld [vmem:[%s28_s0] ss:$0 sm:$0xff] }
   0x2   :  { %5 = vst [vmem:[%s29_s1] sm:$0xff] %v4_v0  ;;  %8 = vst [vmem:[%s29_s1 + $0x8] sm:$0xff] %v4_v0 }

// kernel: tile.18
= control target key start
LH: loop header
LB: loop body
LE: loop exit
PB: predicated region body
PF: predicated region fallthrough
CT: control target
= control target key end

     0   :  { %s131_s10 = smov 120   ;;  %s132_s11 = smov 104   ;;  %vm3_vm0 = vcmask 64512   ;;  %vm9_vm1 = vcmask 1048512   ;;  %vm15_vm2 = vcmask 982912   ;;  %vm21_vm3 = vcmask 917312   ;;  %s207_s0 = inlined_call_operand.vmem [shape: f32[16,8], index: 0, kind: input, shape index: {}]   ;;  %s208_s1 = inlined_call_operand.vmem [shape: f32[1,128], index: 1, kind: output, shape index: {}]  }
   0x1   :  { %v101_v0 = vld [vmem:[%s207_s0 + $0xf] sm:$0x1]   ;;  %v103_v1 = vld [vmem:[%s207_s0 + $0xd] sm:$0x1]   ;;  %v102_v2 = vld [vmem:[%s207_s0 + $0xe] sm:$0x1]  }
   0x2   :  { %7 = vrot.lane.b32.xlu0 %v101_v0, %s131_s10  ;;  %19 = vrot.lane.b32.xlu1 %v103_v1, %s132_s11  ;;  %v104_v3 = vld [vmem:[%s207_s0 + $0xc] sm:$0x1]   ;;  %s133_s16 = smov 112   ;;  %s134_s17 = smov 96   ;;  %v105_v4 = vld [vmem:[%s207_s0 + $0xb] sm:$0x1]  }
   0x3   :  { %v106_v5 = vld [vmem:[%s207_s0 + $0xa] sm:$0x1]   ;;  %v2_v6 = vld [vmem:[%s207_s0] sm:$0x1]   ;;  %s135_s24 = smov 88   ;;  %s136_s25 = smov 80  }
   0x4   :  { %4 = vst.msk [vmem:[#allocation0] sm:$0x1] %vm3_vm0, %v2_v6   ;;  %v107_v7 = vld [vmem:[%s207_s0 + $0x9] sm:$0x1]   ;;  %v108_v8 = vld [vmem:[%s207_s0 + $0x8] sm:$0x1]  }
   0x5   :  { %s137_s30 = smov 72   ;;  %s138_s2 = smov 64   ;;  %v109_v9 = vld [vmem:[%s207_s0 + $0x7] sm:$0x1]   ;;  %v110_v10 = vld [vmem:[%s207_s0 + $0x6] sm:$0x1]  }
   0x6   :  { %13 = vrot.lane.b32.xlu0 %v102_v2, %s133_s16  ;;  %25 = vrot.lane.b32.xlu1 %v104_v3, %s134_s17  ;;  %s139_s7 = smov 56   ;;  %s140_s8 = smov 48   ;;  %v111_v11 = vld [vmem:[%s207_s0 + $0x5] sm:$0x1]   ;;  %v112_v12 = vld [vmem:[%s207_s0 + $0x4] sm:$0x1]  }
   0x7   :  { %s141_s13 = smov 40   ;;  %s142_s14 = smov 32   ;;  %v113_v13 = vld [vmem:[%s207_s0 + $0x3] sm:$0x1]   ;;  %v114_v14 = vld [vmem:[%s207_s0 + $0x2] sm:$0x1]  }
   0x8   :  { %s143_s19 = smov 24   ;;  %s144_s20 = smov 16   ;;  %v115_v15 = vld [vmem:[%s207_s0 + $0x1] sm:$0x1]   ;;  %vm27_vm4 = vcmask 851712   ;;  %vm33_vm5 = vcmask 786112  }
   0x9   :  { %s145_s0 = smov 8   ;;  %vm39_vm6 = vcmask 720512   ;;  %vm45_vm7 = vcmask 654912   ;;  %vm51_vm8 = vcmask 589312   ;;  %vm57_vm9 = vcmask 523712  }
   0xa   :  { %31 = vrot.lane.b32.xlu0 %v105_v4, %s135_s24  ;;  %37 = vrot.lane.b32.xlu1 %v106_v5, %s136_s25  ;;  %vm63_vm10 = vcmask 458112   ;;  %vm69_vm11 = vcmask 392512   ;;  %vm75_vm12 = vcmask 326912   ;;  %vm81_vm13 = vcmask 261312  }
   0xb   :  { %vm87_vm14 = vcmask 195712   ;;  %vm93_vm15 = vcmask 130112  }
   0xe   :  { %43 = vrot.lane.b32.xlu0 %v107_v7, %s137_s30  ;;  %49 = vrot.lane.b32.xlu1 %v108_v8, %s138_s2 }
  0x12   :  { %55 = vrot.lane.b32.xlu0 %v109_v9, %s139_s7  ;;  %61 = vrot.lane.b32.xlu1 %v110_v10, %s140_s8 }
  0x16   :  { %67 = vrot.lane.b32.xlu0 %v111_v11, %s141_s13  ;;  %73 = vrot.lane.b32.xlu1 %v112_v12, %s142_s14 }
  0x1a   :  { %79 = vrot.lane.b32.xlu0 %v113_v13, %s143_s19  ;;  %85 = vrot.lane.b32.xlu1 %v114_v14, %s144_s20 }
  0x1e   :  { %91 = vrot.lane.b32.xlu0 %v115_v15, %s145_s0 }
  0x74   :  { %v8_v16 = vpop.permute.xlu0 %7   ;;  %v20_v17 = vpop.permute.xlu1 %19  }
  0x75   :  { %10 = vst.msk [vmem:[#allocation0] sm:$0x1] %vm9_vm1, %v8_v16  }
  0x78   :  { %v14_v18 = vpop.permute.xlu0 %13   ;;  %v26_v19 = vpop.permute.xlu1 %25  }
  0x79   :  { %16 = vst.msk [vmem:[#allocation0] sm:$0x1] %vm15_vm2, %v14_v18  }
  0x7a   :  { %22 = vst.msk [vmem:[#allocation0] sm:$0x1] %vm21_vm3, %v20_v17  }
  0x7b   :  { %28 = vst.msk [vmem:[#allocation0] sm:$0x1] %vm27_vm4, %v26_v19  }
  0x7c   :  { %v32_v20 = vpop.permute.xlu0 %31   ;;  %v38_v21 = vpop.permute.xlu1 %37  }
  0x7d   :  { %34 = vst.msk [vmem:[#allocation0] sm:$0x1] %vm33_vm5, %v32_v20  }
  0x7e   :  { %40 = vst.msk [vmem:[#allocation0] sm:$0x1] %vm39_vm6, %v38_v21  }
  0x80   :  { %v44_v22 = vpop.permute.xlu0 %43   ;;  %v50_v23 = vpop.permute.xlu1 %49  }
  0x81   :  { %46 = vst.msk [vmem:[#allocation0] sm:$0x1] %vm45_vm7, %v44_v22  }
  0x82   :  { %52 = vst.msk [vmem:[#allocation0] sm:$0x1] %vm51_vm8, %v50_v23  }
  0x84   :  { %v56_v24 = vpop.permute.xlu0 %55   ;;  %v62_v25 = vpop.permute.xlu1 %61  }
  0x85   :  { %58 = vst.msk [vmem:[#allocation0] sm:$0x1] %vm57_vm9, %v56_v24  }
  0x86   :  { %64 = vst.msk [vmem:[#allocation0] sm:$0x1] %vm63_vm10, %v62_v25  }
  0x88   :  { %v68_v26 = vpop.permute.xlu0 %67   ;;  %v74_v27 = vpop.permute.xlu1 %73  }
  0x89   :  { %70 = vst.msk [vmem:[#allocation0] sm:$0x1] %vm69_vm11, %v68_v26  }
  0x8a   :  { %76 = vst.msk [vmem:[#allocation0] sm:$0x1] %vm75_vm12, %v74_v27  }
  0x8c   :  { %v80_v28 = vpop.permute.xlu0 %79   ;;  %v86_v29 = vpop.permute.xlu1 %85  }
  0x8d   :  { %82 = vst.msk [vmem:[#allocation0] sm:$0x1] %vm81_vm13, %v80_v28  }
  0x8e   :  { %88 = vst.msk [vmem:[#allocation0] sm:$0x1] %vm87_vm14, %v86_v29  }
  0x90   :  { %v92_v30 = vpop.permute.xlu0 %91  }
  0x91   :  { %94 = vst.msk [vmem:[#allocation0] sm:$0x1] %vm93_vm15, %v92_v30  }
  0x98   :  { %v98_v31 = vld [vmem:[#allocation0] sm:$0x1] }
  0x99   :  { %100 = vst [vmem:[%s208_s1] sm:$0x1] %v98_v31 }

// kernel: encoder_block.2
= control target key start
LH: loop header
LB: loop body
LE: loop exit
PB: predicated region body
PF: predicated region fallthrough
CT: control target
= control target key end

     0   :  { %s563_s12 = smov 0   ;;  %s635_s0 = inlined_call_operand.vmem [shape: bf16[32,64], index: 0, kind: input, shape index: {}]   ;;  %s636_s1 = inlined_call_operand.vmem [shape: bf16[192,128], index: 1, kind: input, shape index: {}]   ;;  %s637_s2 = inlined_call_operand.vmem [shape: bf16[32,128], index: 2, kind: output, shape index: {0}]   ;;  %s638_s3 = inlined_call_operand.vmem [shape: f32[2,2,128], index: 3, kind: output, shape index: {1}]  }
   0x1 LB: > { %s569_s13 = sadd.s32 4294967295, %s539_s12   ;;  %p479_p0 = scmp.ge.s32.totalorder %s539_s12, 1  ;;  %s539_s12 = sphi %s563_s12, %s14_s12  }
   0x2   : > { %p141_p1 = scmp.lt.s32.totalorder %s539_s12, 3 }
   0x4   : > { %p142_p2 = pnand %p479_p0, %p141_p1 }
   0x5   : > { %s480_s14 = sshll.u32 (!%p142_p2), %s569_s13, 1  ;;  %v521_v0 = vld [vmem:[%s636_s1] sm:$0xff] (!%p142_p2)   ;;  %v541_v1 = vmov (!%p142_p2), 0   ;;  %v522_v2 = vld [vmem:[%s636_s1 + $0x8] sm:$0xff] (!%p142_p2)   ;;  %v523_v3 = vld [vmem:[%s636_s1 + $0x10] sm:$0xff] (!%p142_p2)   ;;  %s542_s25 = smov (!%p142_p2), 64  }
   0x6   : > { %145 = sbr.rel (%p142_p2) target bundleno = 365 (0x16d), region = 28  ;;  %p170_p3 = scmp.lt.s32.totalorder (!%p142_p2), %s480_s14, 3  ;;  %318 = vmatprep.subr.bf16.mxu0 (!%p142_p2), %v541_v1  ;;  %v524_v6 = vld [vmem:[%s636_s1 + $0x18] sm:$0xff] (!%p142_p2)   ;;  %vm208_vm0 = vcmask (!%p142_p2), 1047552   ;;  %vm209_vm1 = vsmask.f32 (!%p142_p2), 7424 }
   0x7   : > { %319 = vmatpush1.bf16.msra.mxu0 (!%p142_p2), %v521_v0  ;;  %v525_v11 = vld [vmem:[%s636_s1 + $0x20] sm:$0xff] (!%p142_p2)   ;;  %vm210_vm2 = vmand (!%p142_p2), %vm208_vm0, %vm209_vm1  ;;  %vm214_vm3 = vcmask (!%p142_p2), 523264   ;;  %v526_v14 = vld [vmem:[%s636_s1 + $0x28] sm:$0xff] (!%p142_p2)   ;;  %vm201_vm4 = vcmask (!%p142_p2), 1040384   ;;  %vm202_vm5 = vsmask.f32 (!%p142_p2), 256 }
   0x8   : > { %320 = vmatprep.subr.bf16.mxu0 (!%p142_p2), %v541_v1  ;;  %v527_v15 = vld [vmem:[%s636_s1 + $0x30] sm:$0xff] (!%p142_p2)   ;;  %v528_v16 = vld [vmem:[%s636_s1 + $0x38] sm:$0xff] (!%p142_p2)   ;;  %v529_v17 = vld [vmem:[%s636_s1 + $0x40] sm:$0xff] (!%p142_p2)   ;;  %p181_p4 = scmp.lt.s32.totalorder (!%p142_p2), %s569_s13, 1 }
   0x9   : > { %v530_v18 = vld [vmem:[%s636_s1 + $0x48] sm:$0xff] (!%p142_p2)   ;;  %v531_v19 = vld [vmem:[%s636_s1 + $0x50] sm:$0xff] (!%p142_p2)   ;;  %v532_v20 = vld [vmem:[%s636_s1 + $0x58] sm:$0xff] (!%p142_p2)  }
   0xa   : > { %vm203_vm6 = vmand (!%p142_p2), %vm201_vm4, %vm202_vm5 }
   0xb   : > { %321 = vmatpush1.bf16.msra.mxu0 (!%p142_p2), %v522_v2 }
   0xc   : > { %322 = vmatprep.subr.bf16.mxu0 (!%p142_p2), %v541_v1 }
   0xd   : > { %s640_s14 = smov (!%p170_p3, %s480_s14), 3  ;;  %s642_s13 = smov (!%p181_p4, %s569_s13), 1 }
   0xe   : > { %s481_s19 = sshll.u32 %s640_s14, 2  ;;  %s484_s14 = sshll.u32 %s642_s13, 1 }
   0xf   : > { %s173_s22 = scalar_lea.vmem %s635_s0, %s481_s19  ;;  %323 = vmatpush1.bf16.msra.mxu0 %v523_v3  ;;  %s179_s23 = scalar_lea.vmem %s637_s2, %s481_s19 }
  0x10   : > { %v520_v4 = vld [vmem:[%s173_s22] sm:$0xff]   ;;  %324 = vmatprep.subr.bf16.mxu0 %v541_v1 }
  0x11   : > { %212 = vrot.lane.b32.xlu0 %v520_v4, %s542_s25  ;;  %v194_v5 = vshrl.u32 %v520_v4, 16  ;;  %v197_v7 = vshll.u32 %v520_v4, 16  ;;  %s184_s25 = scalar_lea.vmem %s638_s3, %s484_s14 }
  0x13   : > { %v196_v8 = vrot.slane %v194_v5, 7  ;;  %v205_v9 = vrot.slane %v197_v7, 1  ;;  %325 = vmatpush1.bf16.msra.mxu0 %v524_v6 }
  0x14   : > { %326 = vmatprep.subr.bf16.mxu0 %v541_v1 }
  0x15   : > { %v199_v10 = vor.u32 %v197_v7, %v196_v8  ;;  %v206_v12 = vor.u32 %v205_v9, %v194_v5 }
  0x17   : > { %v211_v13 = vsel %vm210_vm2, %v206_v12, 0  ;;  %327 = vmatpush1.bf16.msra.mxu0 %v525_v11  ;;  %v204_v21 = vsel %vm203_vm6, 0, %v199_v10 }
  0x18   : > { %498 = vmatprep.mubr.msk.bf16.mxu0 %vm214_vm3, %v211_v13  ;;  %328 = vmatprep.subr.bf16.mxu0 %v541_v1 }
  0x1b   : > { %329 = vmatpush1.bf16.msra.mxu0 %v526_v14 }
  0x1c   : > { %330 = vmatprep.subr.bf16.mxu0 %v541_v1 }
  0x1f   : > { %331 = vmatpush1.bf16.msra.mxu0 %v527_v15 }
  0x20   : > { %332 = vmatprep.subr.bf16.mxu0 %v541_v1 }
  0x23   : > { %333 = vmatpush1.bf16.msra.mxu0 %v528_v16 }
  0x24   : > { %334 = vmatprep.subr.bf16.mxu0 %v541_v1 }
  0x27   : > { %335 = vmatpush1.bf16.msra.mxu0 %v529_v17 }
  0x28   : > { %336 = vmatprep.subr.bf16.mxu0 %v541_v1 }
  0x2b   : > { %337 = vmatpush1.bf16.msra.mxu0 %v530_v18 }
  0x2c   : > { %338 = vmatprep.subr.bf16.mxu0 %v541_v1 }
  0x2f   : > { %339 = vmatpush1.bf16.msra.mxu0 %v531_v19 }
  0x30   : > { %340 = vmatprep.subr.bf16.mxu0 %v541_v1 }
  0x33   : > { %341 = vmatpush1.bf16.msra.mxu0 %v532_v20 }
  0x83   : > { %v213_v22 = vpop.permute.xlu0 %212 }
  0x84   : > { %v217_v23 = vsel %vm214_vm3, %v204_v21, %v213_v22 }
  0x85   : > { %351 = vmatmul.mubr.bf16.vlgmr.msra.gmra.mrb[0].mxu0 %v217_v23 }
 0x158   : > { %v352_v24 = vpop.f32.mrb[0].mxu0 }
 0x159   : > { %v354_v25 = vpop.f32.mrb[1].mxu0  ;;  %v366_v27 = vmul.f32 %v352_v24, %v352_v24 }
 0x15a   : > { %v355_v26 = vpop.f32.mrb[2].mxu0 }
 0x15b   : > { %v359_v28 = vadd.f32 %v355_v26, %v352_v24  ;;  %v367_v29 = vmul.f32 %v355_v26, %v355_v26  ;;  %v508_v30 = vpack.c.bf16 %v355_v26, %v352_v24  ;;  %v357_v31 = vpop.f32.mrb[3].mxu0 }
 0x15d   : > { %v360_v32 = vrot.slane %v359_v28, 4  ;;  %v368_v33 = vadd.f32 %v367_v29, %v366_v27  ;;  %509 = vst [vmem:[%s179_s23] sm:$0xff] %v508_v30  }
 0x15f   : > { %v361_v34 = vadd.f32 %v360_v32, %v359_v28  ;;  %v369_v35 = vrot.slane %v368_v33, 4 }
 0x161   : > { %v362_v36 = vrot.slane %v361_v34, 2  ;;  %v370_v37 = vadd.f32 %v369_v35, %v368_v33 }
 0x163   : > { %v363_v38 = vadd.f32 %v362_v36, %v361_v34  ;;  %v371_v39 = vrot.slane %v370_v37, 2 }
 0x165   : > { %v364_v40 = vrot.slane %v363_v38, 1  ;;  %v372_v41 = vadd.f32 %v371_v39, %v370_v37 }
 0x167   : > { %v373_v42 = vrot.slane %v372_v41, 1  ;;  %v365_v43 = vadd.f32 %v364_v40, %v363_v38 }
 0x169   : > { %v374_v44 = vadd.f32 %v373_v42, %v372_v41 }
 0x16b   : > { %v376_v45 = vsel %vm201_vm4, %v365_v43, %v374_v44 }
 0x16c   : > { %377 = vst [vmem:[%s184_s25] sm:$0x3] %v376_v45 }
 0x16d PF: > { %s14_s12 = sadd.s32 1, %s539_s12  }
 0x16e   : > { %p11_p5 = scmp.ge.s32.totalorder %s14_s12, 4  }
 0x170   :  { %13 = sbr.rel (!%p11_p5) target bundleno = 1 (0x1), region = 70 }

// kernel: encoder_block.3
= control target key start
LH: loop header
LB: loop body
LE: loop exit
PB: predicated region body
PF: predicated region fallthrough
CT: control target
= control target key end

     0   :  { %s856_s20 = smov 0   ;;  %s977_s0 = inlined_call_operand.vmem [shape: bf16[32,128], index: 0, kind: input, shape index: {}]   ;;  %s978_s1 = inlined_call_operand.vmem [shape: f32[2,128], index: 1, kind: input, shape index: {}]   ;;  %s979_s2 = inlined_call_operand.vmem [shape: bf16[384,128], index: 2, kind: input, shape index: {}]   ;;  %s980_s3 = inlined_call_operand.<no memory space> [shape: f32[1,1], index: 3, kind: input, shape index: {}]   ;;  %s981_s4 = inlined_call_operand.vmem [shape: bf16[32,128], index: 4, kind: output, shape index: {0}]   ;;  %s982_s5 = inlined_call_operand.vmem [shape: f32[2,2,128], index: 5, kind: output, shape index: {1}]  }
   0x1   :  { %11 = sst [smem:[#allocation2]] %s980_s3 }
   0x2 LB: > { %s862_s21 = sadd.s32 4294967295, %s819_s20   ;;  %p681_p0 = scmp.ge.s32.totalorder %s819_s20, 1  ;;  %s819_s20 = sphi %s856_s20, %s17_s20  }
   0x3   : > { %p192_p1 = scmp.lt.s32.totalorder %s819_s20, 3 }
   0x5   : > { %p193_p2 = pnand %p681_p0, %p192_p1 }
   0x6   : > { %v789_v0 = vld [vmem:[%s979_s2 + $0x40] sm:$0xff] (!%p193_p2)   ;;  %v821_v1 = vmov (!%p193_p2), 0.0   ;;  %v792_v4 = vld [vmem:[%s979_s2 + $0x48] sm:$0xff] (!%p193_p2)   ;;  %vm822_vm0 = vmmov (!%p193_p2), 0   ;;  %v795_v7 = vld [vmem:[%s979_s2 + $0x50] sm:$0xff] (!%p193_p2)   ;;  %s682_s12 = sshll.u32 (!%p193_p2), %s862_s21, 1 }
   0x7   : > { %196 = sbr.rel (%p193_p2) target bundleno = 276 (0x114), region = 36  ;;  %759 = vmatprep.subr.bf16.mxu1 (!%p193_p2), %v821_v1  ;;  %v790_v2 = vld [vmem:[%s979_s2] sm:$0xff] (!%p193_p2)   ;;  %728 = vmatprep.subr.bf16.mxu0 (!%p193_p2), %v789_v0  ;;  %v793_v5 = vld [vmem:[%s979_s2 + $0x8] sm:$0xff] (!%p193_p2)   ;;  %v796_v8 = vld [vmem:[%s979_s2 + $0x10] sm:$0xff] (!%p193_p2)   ;;  %p225_p3 = scmp.lt.s32.totalorder (!%p193_p2), %s682_s12, 3  ;;  %vm276_vm3 = vcmask (!%p193_p2), 1040384  }
   0x8   : > { %v791_v3 = vld [vmem:[%s979_s2 + $0x80] sm:$0xff] (!%p193_p2)   ;;  %729 = vmatpush3.bf16.msra.mxu0 (!%p193_p2), %v790_v2  ;;  %775 = vmatprep.mubr.msk.bf16.mxu1 (!%p193_p2), %vm822_vm0, %v821_v1  ;;  %v794_v6 = vld [vmem:[%s979_s2 + $0x88] sm:$0xff] (!%p193_p2)   ;;  %v797_v9 = vld [vmem:[%s979_s2 + $0x90] sm:$0xff] (!%p193_p2)   ;;  %s241_s3 = sld [smem:[#allocation2]] (!%p193_p2)  ;;  %vm277_vm4 = vsmask.f32 (!%p193_p2), 256 }
   0x9   : > { %760 = vmatpush3.bf16.msra.mxu1 (!%p193_p2), %v791_v3  ;;  %730 = vmatprep.subr.bf16.mxu0 (!%p193_p2), %v792_v4  ;;  %v798_v10 = vld [vmem:[%s979_s2 + $0x58] sm:$0xff] (!%p193_p2)   ;;  %v801_v13 = vld [vmem:[%s979_s2 + $0x60] sm:$0xff] (!%p193_p2)   ;;  %v804_v16 = vld [vmem:[%s979_s2 + $0x68] sm:$0xff] (!%p193_p2)   ;;  %vm283_vm5 = vcmask (!%p193_p2), 1047552   ;;  %vm284_vm6 = vsmask.f32 (!%p193_p2), 7424 }
   0xa   : > { %761 = vmatprep.subr.bf16.mxu1 (!%p193_p2), %v821_v1  ;;  %v799_v11 = vld [vmem:[%s979_s2 + $0x18] sm:$0xff] (!%p193_p2)   ;;  %v802_v14 = vld [vmem:[%s979_s2 + $0x20] sm:$0xff] (!%p193_p2)   ;;  %v805_v17 = vld [vmem:[%s979_s2 + $0x28] sm:$0xff] (!%p193_p2)   ;;  %p236_p4 = scmp.lt.s32.totalorder (!%p193_p2), %s862_s21, 1 }
   0xb   : > { %v800_v12 = vld [vmem:[%s979_s2 + $0x98] sm:$0xff] (!%p193_p2)   ;;  %v803_v15 = vld [vmem:[%s979_s2 + $0xa0] sm:$0xff] (!%p193_p2)   ;;  %v806_v18 = vld [vmem:[%s979_s2 + $0xa8] sm:$0xff] (!%p193_p2)  }
   0xc   : > { %731 = vmatpush3.bf16.msra.mxu0 (!%p193_p2), %v793_v5  ;;  %v807_v19 = vld [vmem:[%s979_s2 + $0x70] sm:$0xff] (!%p193_p2)   ;;  %v810_v22 = vld [vmem:[%s979_s2 + $0x78] sm:$0xff] (!%p193_p2)   ;;  %v687_v24 = vld [vmem:[%s978_s1] ss:$0 sm:$0xff] (!%p193_p2) }
   0xd   : > { %762 = vmatpush3.bf16.msra.mxu1 (!%p193_p2), %v794_v6  ;;  %732 = vmatprep.subr.bf16.mxu0 (!%p193_p2), %v795_v7  ;;  %v808_v20 = vld [vmem:[%s979_s2 + $0x30] sm:$0xff] (!%p193_p2)   ;;  %v688_v27 = vld [vmem:[%s978_s1 + $0x1] ss:$0 sm:$0xff] (!%p193_p2)  ;;  %v811_v28 = vld [vmem:[%s979_s2 + $0x38] sm:$0xff] (!%p193_p2)  }
   0xe   : > { %763 = vmatprep.subr.bf16.mxu1 %v821_v1  ;;  %s984_s12 = smov (!%p225_p3, %s682_s12), 3  ;;  %v809_v21 = vld [vmem:[%s979_s2 + $0xb0] sm:$0xff]   ;;  %v812_v31 = vld [vmem:[%s979_s2 + $0xb8] sm:$0xff]   ;;  %v262_v34 = vstv %s241_s3  ;;  %vm278_vm7 = vmand %vm276_vm3, %vm277_vm4  ;;  %s986_s21 = smov (!%p236_p4, %s862_s21), 1 }
   0xf   : > { %s683_s7 = sshll.u32 %s984_s12, 2  ;;  %vm285_vm8 = vmand %vm283_vm5, %vm284_vm6  ;;  %s686_s12 = sshll.u32 %s986_s21, 1 }
  0x10   : > { %733 = vmatpush3.bf16.msra.mxu0 %v796_v8  ;;  %s228_s15 = scalar_lea.vmem %s977_s0, %s683_s7  ;;  %s234_s10 = scalar_lea.vmem %s981_s4, %s683_s7 }
  0x11   : > { %764 = vmatpush3.bf16.msra.mxu1 %v797_v9  ;;  %734 = vmatprep.subr.bf16.mxu0 %v798_v10  ;;  %v720_v23 = vld [vmem:[%s228_s15] sm:$0xff]   ;;  %s239_s13 = scalar_lea.vmem %s982_s5, %s686_s12 }
  0x12   : > { %765 = vmatprep.subr.bf16.mxu1 %v821_v1  ;;  %v721_v25 = vunpack.c.l.bf16 %v720_v23  ;;  %v722_v26 = vunpack.c.h.bf16 %v720_v23 }
  0x14   : > { %735 = vmatpush3.bf16.msra.mxu0 %v799_v11  ;;  %v251_v29 = vmul.f32 %v721_v25, %v687_v24  ;;  %v252_v30 = vmul.f32 %v722_v26, %v687_v24 }
  0x15   : > { %766 = vmatpush3.bf16.msra.mxu1 %v800_v12  ;;  %736 = vmatprep.subr.bf16.mxu0 %v801_v13 }
  0x16   : > { %767 = vmatprep.subr.bf16.mxu1 %v821_v1  ;;  %v258_v32 = vadd.f32 %v688_v27, %v251_v29  ;;  %v259_v33 = vadd.f32 %v688_v27, %v252_v30 }
  0x18   : > { %737 = vmatpush3.bf16.msra.mxu0 %v802_v14  ;;  %vm260_vm1 = vcmp.gt.f32.partialorder %v258_v32, 0.0  ;;  %vm261_vm2 = vcmp.gt.f32.partialorder %v259_v33, 0.0  ;;  %v263_v35 = vmul.f32 %v262_v34, %v258_v32  ;;  %v264_v36 = vmul.f32 %v262_v34, %v259_v33 }
  0x19   : > { %768 = vmatpush3.bf16.msra.mxu1 %v803_v15  ;;  %738 = vmatprep.subr.bf16.mxu0 %v804_v16 }
  0x1a   : > { %769 = vmatprep.subr.bf16.mxu1 %v821_v1  ;;  %v265_v37 = vsel %vm260_vm1, %v258_v32, %v263_v35  ;;  %v266_v38 = vsel %vm261_vm2, %v259_v33, %v264_v36 }
  0x1b   : > { %v267_v39 = vpack.c.bf16 %v266_v38, %v265_v37 }
  0x1c   : > { %739 = vmatpush3.bf16.msra.mxu0 %v805_v17 }
  0x1d   : > { %770 = vmatpush3.bf16.msra.mxu1 %v806_v18  ;;  %740 = vmatprep.subr.bf16.mxu0 %v807_v19  ;;  %v269_v40 = vshrl.u32 %v267_v39, 16  ;;  %v272_v41 = vshll.u32 %v267_v39, 16 }
  0x1e   : > { %771 = vmatprep.subr.bf16.mxu1 %v821_v1  ;;  %511 = vmatprep.mubr.bf16.mxu0 %v267_v39 }
  0x1f   : > { %v271_v42 = vrot.slane %v269_v40, 7  ;;  %v280_v43 = vrot.slane %v272_v41, 1 }
  0x20   : > { %741 = vmatpush3.bf16.msra.mxu0 %v808_v20 }
  0x21   : > { %772 = vmatpush3.bf16.msra.mxu1 %v809_v21  ;;  %742 = vmatprep.subr.bf16.mxu0 %v810_v22  ;;  %v274_v44 = vor.u32 %v272_v41, %v271_v42  ;;  %v281_v45 = vor.u32 %v280_v43, %v269_v40 }
  0x22   : > { %773 = vmatprep.subr.bf16.mxu1 %v821_v1 }
  0x23   : > { %v279_v46 = vsel %vm278_vm7, 0, %v274_v44  ;;  %v286_v47 = vsel %vm285_vm8, %v281_v45, 0 }
  0x24   : > { %743 = vmatpush3.bf16.msra.mxu0 %v811_v28 }
  0x25   : > { %774 = vmatpush3.bf16.msra.mxu1 %v812_v31 }
  0x27   : > { %512 = vmatmul.mubr.bf16.vlgmr.msra.gmra.mrb[0].mxu0 %v279_v46 }
  0x28   : > { %776 = vmatmul.mubr.bf16.vlgmr.msra.gmra.mrb[0].mxu1 %v286_v47 }
  0xfa   : > { %v744_v48 = vpop.f32.mrb[0].mxu0 }
  0xfb   : > { %v554_v49 = vpop.f32.mrb[0].mxu1  ;;  %v745_v50 = vpop.f32.mrb[1].mxu0 }
  0xfc   : > { %v777_v51 = vpop.f32.mrb[1].mxu1  ;;  %v746_v52 = vadd.f32 %v745_v50, %v744_v48  ;;  %v747_v53 = vpop.f32.mrb[2].mxu0 }
  0xfd   : > { %v557_v54 = vpop.f32.mrb[2].mxu1  ;;  %v748_v55 = vpop.f32.mrb[3].mxu0 }
  0xfe   : > { %v778_v56 = vpop.f32.mrb[3].mxu1  ;;  %v555_v57 = vadd.f32 %v746_v52, %v554_v49  ;;  %v749_v58 = vadd.f32 %v748_v55, %v747_v53 }
 0x100   : > { %v558_v59 = vadd.f32 %v749_v58, %v557_v54  ;;  %v568_v60 = vmul.f32 %v555_v57, %v555_v57 }
 0x102   : > { %v561_v61 = vadd.f32 %v558_v59, %v555_v57  ;;  %v569_v62 = vmul.f32 %v558_v59, %v558_v59  ;;  %v726_v63 = vpack.c.bf16 %v558_v59, %v555_v57 }
 0x104   : > { %v562_v0 = vrot.slane %v561_v61, 4  ;;  %v570_v1 = vadd.f32 %v569_v62, %v568_v60  ;;  %727 = vst [vmem:[%s234_s10] sm:$0xff] %v726_v63  }
 0x106   : > { %v563_v2 = vadd.f32 %v562_v0, %v561_v61  ;;  %v571_v3 = vrot.slane %v570_v1, 4 }
 0x108   : > { %v564_v4 = vrot.slane %v563_v2, 2  ;;  %v572_v5 = vadd.f32 %v571_v3, %v570_v1 }
 0x10a   : > { %v565_v6 = vadd.f32 %v564_v4, %v563_v2  ;;  %v573_v7 = vrot.slane %v572_v5, 2 }
 0x10c   : > { %v566_v8 = vrot.slane %v565_v6, 1  ;;  %v574_v9 = vadd.f32 %v573_v7, %v572_v5 }
 0x10e   : > { %v575_v10 = vrot.slane %v574_v9, 1  ;;  %v567_v11 = vadd.f32 %v566_v8, %v565_v6 }
 0x110   : > { %v576_v12 = vadd.f32 %v575_v10, %v574_v9 }
 0x112   : > { %v578_v13 = vsel %vm276_vm3, %v567_v11, %v576_v12 }
 0x113   : > { %579 = vst [vmem:[%s239_s13] sm:$0x3] %v578_v13 }
 0x114 PF: > { %s17_s20 = sadd.s32 1, %s819_s20  }
 0x115   : > { %p14_p5 = scmp.ge.s32.totalorder %s17_s20, 4  }
 0x117   :  { %16 = sbr.rel (!%p14_p5) target bundleno = 2 (0x2), region = 78 }

</bundles_post_ra>
